<compile_context>
chip_gen: v7x
topology: tpu7x:2x2x1
jax: 0.10.0
libtpu: 0.0.40
codegen_flags: <defaults>
</compile_context>

<pallas_src>
import functools

import jax
import jax.numpy as jnp
from jax.experimental import pallas as pl
from jax.experimental.pallas import tpu as pltpu


def _round_up(x: int, m: int) -> int:
    return (x + m - 1) // m * m


def _choose_tiling(M: int, max_tile: int = 1024):
    """Pick (tile_m, M_pad).

    Rows padded/tiled in multiples of 16 (bf16 packed sublane tile).  Small
    problems use a single grid step; large ones use up-to-1024-row tiles with
    an even number of grid steps (v7x megacore balance).  On v5e/v6e extra
    steps are pure overhead, so fewer/bigger tiles are strictly better.
    """
    m16 = _round_up(max(M, 16), 16)
    if m16 <= max_tile:
        return m16, m16                      # single grid step covers all rows
    steps = -(-m16 // max_tile)
    if steps % 2:                            # keep step count even for v7x
        steps += 1
    tile_m = _round_up(-(-m16 // steps), 16)
    return tile_m, tile_m * steps


# ----------------------------- Pallas kernel ------------------------------ #

def _patch_embed_kernel(*refs, apply_norm: bool, eps: float, e_real: int):
    # refs (apply_norm=True):  x, w, b, gamma, beta, out
    # refs (apply_norm=False): x, w, b, out
    if apply_norm:
        x_ref, w_ref, b_ref, g_ref, beta_ref, o_ref = refs
    else:
        x_ref, w_ref, b_ref, o_ref = refs
        g_ref = beta_ref = None

    # bf16 X / W go straight into the MXU with f32 accumulation.
    y = jnp.dot(x_ref[...], w_ref[...], preferred_element_type=jnp.float32)
    y = y + b_ref[...]                                  # f32 bias add

    if apply_norm:
        e_pad = y.shape[-1]
        inv_e = 1.0 / float(e_real)
        if e_real == e_pad:
            mean = jnp.mean(y, axis=-1, keepdims=True)
            yc = y - mean
            var = jnp.mean(yc * yc, axis=-1, keepdims=True)
        else:
            # Padded E lanes of y are exactly 0 (zero weight cols / zero bias),
            # so plain lane sums only see the real e_real lanes — no mask needed.
            mean = jnp.sum(y, axis=-1, keepdims=True) * inv_e
            var = jnp.sum(y * y, axis=-1, keepdims=True) * inv_e - mean * mean
            var = jnp.maximum(var, 0.0)
            yc = y - mean            # padded lanes hold -mean: sliced off later
        y = yc * jax.lax.rsqrt(var + eps)               # LN math kept in f32
        y = y * g_ref[...] + beta_ref[...]

    o_ref[...] = y.astype(o_ref.dtype)


def _patch_proj_pallas(x_rows, w_mat, bias, gamma, beta, *, apply_norm,
                       e_real, tile_m, out_dtype, eps=1e-5):
    M_pad, K = x_rows.shape
    E_pad = w_mat.shape[1]
    assert M_pad % tile_m == 0 and E_pad % 128 == 0 and w_mat.shape[0] == K

    kernel = functools.partial(_patch_embed_kernel, apply_norm=apply_norm,
                               eps=eps, e_real=e_real)

    in_specs = [
        pl.BlockSpec((tile_m, K), lambda i: (i, 0)),     # X tile, full (real) K
        pl.BlockSpec((K, E_pad), lambda i: (0, 0)),      # W (stays resident)
        pl.BlockSpec((1, E_pad), lambda i: (0, 0)),      # bias
    ]
    args = [x_rows, w_mat, bias]
    if apply_norm:
        in_specs += [pl.BlockSpec((1, E_pad), lambda i: (0, 0)),
                     pl.BlockSpec((1, E_pad), lambda i: (0, 0))]
        args += [gamma, beta]

    nbytes = lambda a: a.size * a.dtype.itemsize
    bytes_accessed = (sum(nbytes(a) for a in args)
                      + M_pad * E_pad * jnp.dtype(out_dtype).itemsize)
    cost = pl.CostEstimate(flops=2 * M_pad * K * E_pad,
                           transcendentals=M_pad if apply_norm else 0,
                           bytes_accessed=bytes_accessed)

    return pl.pallas_call(
        kernel,
        out_shape=jax.ShapeDtypeStruct((M_pad, E_pad), out_dtype),
        grid_spec=pltpu.PrefetchScalarGridSpec(
            num_scalar_prefetch=0,
            grid=(M_pad // tile_m,),
            in_specs=in_specs,
            out_specs=pl.BlockSpec((tile_m, E_pad), lambda i: (i, 0)),
        ),
        compiler_params=pltpu.CompilerParams(
            dimension_semantics=("parallel",),
            # Let XLA fuse the patch-gather transpose/pad/cast into the X input
            # so the patch matrix never round-trips HBM on its own.
            allow_input_fusion=[True] + [False] * (len(args) - 1),
        ),
        cost_estimate=cost,
    )(*args)


# ------------------------------ Module glue ------------------------------- #

class PatchEmbedPallas:
    """JAX/Pallas port of the PyTorch PatchEmbed module."""

    def __init__(self, patch_size=4, in_chans=3, embed_dim=96, use_norm=False,
                 compute_dtype=jnp.bfloat16, out_dtype=None, output_nchw=True,
                 key=None):
        if key is None:
            key = jax.random.PRNGKey(0)
        self.patch_size = (patch_size, patch_size)
        self.in_chans = in_chans
        self.embed_dim = embed_dim
        self.use_norm = use_norm
        self.compute_dtype = compute_dtype
        self.out_dtype = compute_dtype if out_dtype is None else out_dtype
        self.output_nchw = output_nchw

        k1, k2 = jax.random.split(key, 2)
        K = in_chans * patch_size * patch_size
        bound = 1.0 / (K ** 0.5)
        # Conv2d weight [E, C, p, p], bias [E]  (PyTorch default uniform init)
        self.proj_w = jax.random.uniform(
            k1, (embed_dim, in_chans, patch_size, patch_size),
            minval=-bound, maxval=bound, dtype=jnp.float32)
        self.proj_b = jax.random.uniform(
            k2, (embed_dim,), minval=-bound, maxval=bound, dtype=jnp.float32)
        self.gamma = jnp.ones((embed_dim,), jnp.float32) if use_norm else None
        self.beta = jnp.zeros((embed_dim,), jnp.float32) if use_norm else None

        # Precompute kernel operands ONCE.  Only the E (lane) side is padded to
        # 128 for lane-dense stores; K stays at its real size.
        self.k_real = K
        self.e_pad = _round_up(embed_dim, 128)
        w_mat = self.proj_w.reshape(embed_dim, K).T                    # [K, E]
        w_mat = jnp.pad(w_mat, ((0, 0), (0, self.e_pad - embed_dim)))
        self.w_mat = w_mat.astype(compute_dtype)
        self.bias_p = jnp.pad(
            self.proj_b, (0, self.e_pad - embed_dim)).reshape(1, self.e_pad)
        if use_norm:
            self.gamma_p = jnp.pad(
                self.gamma, (0, self.e_pad - embed_dim),
                constant_values=1.0).reshape(1, self.e_pad)
            self.beta_p = jnp.pad(
                self.beta, (0, self.e_pad - embed_dim)).reshape(1, self.e_pad)
        else:
            self.gamma_p = None
            self.beta_p = None

    def __call__(self, x):
        # x: [B, C, H, W]  (NCHW, matching PyTorch)
        B, C, H, W = x.shape
        ph, pw = self.patch_size
        # F.pad(x, (0, pad_w)) pads the right of W; (0,0,0,pad_h) pads bottom of H
        pad_w = (pw - W % pw) % pw
        pad_h = (ph - H % ph) % ph
        if pad_w or pad_h:
            x = jnp.pad(x, ((0, 0), (0, 0), (0, pad_h), (0, pad_w)))
        # Cast BEFORE the patch gather so the transpose round trip is bf16.
        x = x.astype(self.compute_dtype)
        Hp, Wp = H + pad_h, W + pad_w
        Wh, Ww = Hp // ph, Wp // pw
        M = B * Wh * Ww
        K = C * ph * pw

        # Non-overlapping patches, flattened in (c, kh, kw) order.  With
        # allow_input_fusion on input 0, XLA may fuse this whole chain into the
        # pallas input DMA under jit (no separate HBM materialization).
        # TODO(synk): do the (c,kh,kw) gather in-kernel via a multi-axis grid if
        # the fusion ever fails to kick in.
        xp = x.reshape(B, C, Wh, ph, Ww, pw)
        xp = jnp.transpose(xp, (0, 2, 4, 1, 3, 5))       # [B, Wh, Ww, C, ph, pw]
        x_rows = xp.reshape(M, K)

        tile_m, M_pad = _choose_tiling(M)
        if M_pad > M:
            x_rows = jnp.pad(x_rows, ((0, M_pad - M), (0, 0)))

        y = _patch_proj_pallas(x_rows, self.w_mat, self.bias_p,
                               self.gamma_p, self.beta_p,
                               apply_norm=self.use_norm,
                               e_real=self.embed_dim, tile_m=tile_m,
                               out_dtype=self.out_dtype)
        y = y[:M, :self.embed_dim]                       # drop row/lane padding
        y = y.reshape(B, Wh, Ww, self.embed_dim)
        if self.output_nchw:
            y = jnp.transpose(y, (0, 3, 1, 2))           # [B, E, Wh, Ww]
        return y


# --------------------------- Pure-JAX reference ---------------------------- #

def _reference(x, mod: PatchEmbedPallas):
    ph, pw = mod.patch_size
    B, C, H, W = x.shape
    pad_w = (pw - W % pw) % pw
    pad_h = (ph - H % ph) % ph
    if pad_w or pad_h:
        x = jnp.pad(x, ((0, 0), (0, 0), (0, pad_h), (0, pad_w)))
    y = jax.lax.conv_general_dilated(
        x, mod.proj_w, window_strides=(ph, pw), padding="VALID",
        dimension_numbers=("NCHW", "OIHW", "NCHW"))
    y = y + mod.proj_b.reshape(1, -1, 1, 1)
    if mod.use_norm:
        yt = jnp.transpose(y, (0, 2, 3, 1))  # [B, Wh, Ww, E]
        mean = jnp.mean(yt, axis=-1, keepdims=True)
        var = jnp.mean((yt - mean) ** 2, axis=-1, keepdims=True)
        yt = (yt - mean) / jnp.sqrt(var + 1e-5)
        yt = yt * mod.gamma + mod.beta
        y = jnp.transpose(yt, (0, 3, 1, 2))
    return y


# ---------------------------------- main ----------------------------------- #

if __name__ == "__main__":
    key = jax.random.PRNGKey(0)
    kx, kp = jax.random.split(key)

    B, C, H, W = 2, 4, 16, 16
    patch_size, embed_dim = 4, 32
    x = jax.random.normal(kx, (B, C, H, W), dtype=jnp.float32)

    # bf16 matmul inputs / bf16 output vs an f32 reference -> loose tolerance.
    ATOL = RTOL = 5e-2

    ok = True
    for use_norm in (False, True):
        mod = PatchEmbedPallas(patch_size=patch_size, in_chans=C,
                               embed_dim=embed_dim, use_norm=use_norm, key=kp)
        fwd = jax.jit(mod.__call__)          # jit so input fusion can kick in
        out = jax.block_until_ready(fwd(x))
        ref = jax.block_until_ready(_reference(x, mod))
        assert out.shape == (B, embed_dim, H // patch_size, W // patch_size)
        if not jnp.allclose(out.astype(jnp.float32), ref, atol=ATOL, rtol=RTOL):
            ok = False

    # exercise the padding path (H, W not divisible by patch_size)
    x_odd = jax.random.normal(kx, (B, C, 15, 14), dtype=jnp.float32)
    mod = PatchEmbedPallas(patch_size=patch_size, in_chans=C,
                           embed_dim=embed_dim, use_norm=True, key=kp)
    out = jax.block_until_ready(jax.jit(mod.__call__)(x_odd))
    ref = jax.block_until_ready(_reference(x_odd, mod))
    if not jnp.allclose(out.astype(jnp.float32), ref, atol=ATOL, rtol=RTOL):
        ok = False

    if ok:
        print("KERNEL_OK")
    else:
        raise AssertionError("Pallas PatchEmbed output mismatch vs reference")
</pallas_src>

<mosaic_0001>
module attributes {stable_mosaic.version = 11 : i64} {
  func.func @_patch_embed_kernel(%arg0: i32, %arg1: memref<32x64xbf16, #tpu.memory_space<vmem>>, %arg2: memref<64x128xbf16, #tpu.memory_space<vmem>>, %arg3: memref<1x128xf32, #tpu.memory_space<vmem>>, %arg4: memref<32x128xbf16, #tpu.memory_space<vmem>>) attributes {dimension_semantics = [#tpu.dimension_semantics<parallel>], iteration_bounds = array<i64: 1>, scalar_prefetch = 0 : i64, scratch_operands = 0 : i64, tpu.core_type = #tpu.core_type<tc>, window_params = [{transform_indices = @transform_0, window_bounds = array<i64: 32, 64>}, {pipeline_mode = #tpu.pipeline_mode<synchronous>, transform_indices = @transform_1, window_bounds = array<i64: 64, 128>}, {pipeline_mode = #tpu.pipeline_mode<synchronous>, transform_indices = @transform_2, window_bounds = array<i64: 1, 128>}, {transform_indices = @transform_3, window_bounds = array<i64: 32, 128>}]} {
    %c0 = arith.constant 0 : index
    %c0_0 = arith.constant 0 : index
    %0 = vector.load %arg1[%c0, %c0_0] : memref<32x64xbf16, #tpu.memory_space<vmem>>, vector<32x64xbf16>
    %c0_1 = arith.constant 0 : index
    %c0_2 = arith.constant 0 : index
    %1 = vector.load %arg2[%c0_1, %c0_2] : memref<64x128xbf16, #tpu.memory_space<vmem>>, vector<64x128xbf16>
    %cst = arith.constant dense<0.000000e+00> : vector<32x128xf32>
    %2 = tpu.matmul %0, %1, %cst {dimension_numbers = #tpu.dot_dimension_numbers<[1], [0], [0], [1], [0, 0, 1, 1], [], []>} : vector<32x64xbf16>, vector<64x128xbf16>, vector<32x128xf32> -> vector<32x128xf32>
    %c0_3 = arith.constant 0 : index
    %c0_4 = arith.constant 0 : index
    %3 = vector.load %arg3[%c0_3, %c0_4] : memref<1x128xf32, #tpu.memory_space<vmem>>, vector<1x128xf32>
    %4 = vector.broadcast %3 : vector<1x128xf32> to vector<32x128xf32>
    %5 = arith.addf %2, %4 : vector<32x128xf32>
    %6 = arith.truncf %5 : vector<32x128xf32> to vector<32x128xbf16>
    %c0_5 = arith.constant 0 : index
    %c0_6 = arith.constant 0 : index
    %7 = vector.load %arg4[%c0_5, %c0_6] : memref<32x128xbf16, #tpu.memory_space<vmem>>, vector<32x128xbf16>
    tpu.vector_store %arg4[%c0_5, %c0_6], %6 {strides = array<i32>} : memref<32x128xbf16, #tpu.memory_space<vmem>>, vector<32x128xbf16>,
    return
  }
  func.func @transform_0(%arg0: i32) -> (i32, i32) {
    %c0_i32 = arith.constant 0 : i32
    %c0_i32_0 = arith.constant 0 : i32
    return %arg0, %c0_i32 : i32, i32
  }
  func.func @transform_1(%arg0: i32) -> (i32, i32) {
    %c0_i32 = arith.constant 0 : i32
    %c0_i32_0 = arith.constant 0 : i32
    %c0_i32_1 = arith.constant 0 : i32
    return %c0_i32, %c0_i32_0 : i32, i32
  }
  func.func @transform_2(%arg0: i32) -> (i32, i32) {
    %c0_i32 = arith.constant 0 : i32
    %c0_i32_0 = arith.constant 0 : i32
    %c0_i32_1 = arith.constant 0 : i32
    return %c0_i32, %c0_i32_0 : i32, i32
  }
  func.func @transform_3(%arg0: i32) -> (i32, i32) {
    %c0_i32 = arith.constant 0 : i32
    %c0_i32_0 = arith.constant 0 : i32
    return %arg0, %c0_i32 : i32, i32
  }
}

</mosaic_0001>

<bundles_post_ra>
// kernel: a_call__.1
= control target key start
LH: loop header
LB: loop body
LE: loop exit
PB: predicated region body
PF: predicated region fallthrough
CT: control target
= control target key end

     0   :  { %vm69_vm0 = vcmask 523264   ;;  %s296_s0 = inlined_call_operand.vmem [shape: bf16[32,64], index: 0, kind: input, shape index: {}]   ;;  %s297_s1 = inlined_call_operand.vmem [shape: bf16[64,128], index: 1, kind: input, shape index: {}]   ;;  %s298_s2 = inlined_call_operand.vmem [shape: f32[1,128], index: 2, kind: input, shape index: {}]   ;;  %s299_s3 = inlined_call_operand.hbm [shape: bf16[32,128], index: 3, kind: output, shape index: {}]  }
   0x1   :  { %v210_v0 = vld [vmem:[%s297_s1] sm:$0xff]   ;;  %v211_v1 = vld [vmem:[%s297_s1 + $0x8] sm:$0xff]   ;;  %v212_v2 = vld [vmem:[%s297_s1 + $0x10] sm:$0xff]  }
   0x2   :  { %195 = vmatprep.subr.bf16.mxu0 %v210_v0  ;;  %v214_v3 = vld [vmem:[%s296_s0] sm:$0xff]  }
   0x3   :  { %196 = vmatpush3.bf16.msra.mxu0 %v210_v0  ;;  %203 = vmatprep.mubr.msk.bf16.mxu0 %vm69_vm0, %v214_v3 }
   0x4   :  { %197 = vmatprep.subr.bf16.mxu0 %v211_v1 }
   0x5   :  { %8 = vsyncpa [#allocation3], 0  ;;  %v213_v4 = vld [vmem:[%s297_s1 + $0x18] sm:$0xff]   ;;  %v215_v5 = vld [vmem:[%s296_s0 + $0x8] sm:$0xff]   ;;  %s240_s26 = smov [#allocation2]  }
   0x6   :  { %v161_v7 = vld [vmem:[%s298_s2] ss:$0 sm:$0xff]  ;;  %s150_s27 = sshll.u32 %s240_s26, 4  ;;  %s151_s27 = int_to_ptr.vmem [resolvable:$true] %s150_s27 }
   0x7   :  { %198 = vmatpush3.bf16.msra.mxu0 %v211_v1  ;;  %s216_s0 = scalar_lea.vmem %s151_s27, 256  ;;  %p221_p1 = scmp.lt.s32.totalorder %s151_s27, %s151_s27 }
   0x8   :  { %199 = vmatprep.subr.bf16.mxu0 %v212_v2  ;;  %p217_p0 = scmp.ne.s32.totalorder %s151_s27, %s216_s0  ;;  %p222_p2 = scmp.lt.s32.totalorder %s216_s0, %s216_s0 }
   0xa   :  { %p223_p3 = por %p222_p2, %p221_p1 }
   0xb   :  { %200 = vmatpush3.bf16.msra.mxu0 %v212_v2 }
   0xc   :  { %201 = vmatprep.subr.bf16.mxu0 %v213_v4  ;;  %p224_p4 = pnand %p223_p3, %p217_p0 }
   0xf   :  { %202 = vmatpush3.bf16.msra.mxu0 %v213_v4 }
  0x12   :  { %204 = vmatmul.mubr.msk.bf16.vlgmr.msra.gmra.mrb[0].mxu0 %vm69_vm0, %v215_v5 }
  0xe5   :  { %v205_v6 = vpop.f32.mrb[0].mxu0 }
  0xe6   :  { %v110_v8 = vpop.f32.mrb[1].mxu0  ;;  %v119_v10 = vadd.f32 %v205_v6, %v161_v7 }
  0xe7   :  { %v206_v9 = vpop.f32.mrb[2].mxu0  ;;  %v111_v13 = vadd.f32 %v161_v7, %v110_v8 }
  0xe8   :  { %v122_v11 = vadd.f32 %v206_v9, %v161_v7  ;;  %v113_v12 = vpop.f32.mrb[3].mxu0 }
  0xe9   :  { %v114_v14 = vadd.f32 %v161_v7, %v113_v12 }
  0xea   :  { %v186_v15 = vpack.c.bf16 %v122_v11, %v119_v10 }
  0xeb   :  { %v181_v16 = vpack.c.bf16 %v114_v14, %v111_v13 }
  0xec   :  { %188 = vst [vmem:[#allocation2 + $0x8] sm:$0xff] %v186_v15  }
  0xed   :  { %182 = vst [vmem:[#allocation2] sm:$0xff] %v181_v16  }
  0xee   :  { %227 = shalt.err (!%p224_p4)
}
  0xef   :  { %s228_s28 = scalar_lea.hbm %s299_s3, 256 }
  0xf0   :  { %p229_p5 = scmp.ne.s32.totalorder %s299_s3, %s228_s28  ;;  %p232_p6 = scmp.lt.u32.totalorder %s228_s28, %s299_s3 }
  0xf2   :  { %p234_p7 = pnand %p232_p6, %p229_p5 }
  0xf4   :  { %237 = shalt.err (!%p234_p7)
}
  0xf5   :  { %s241_s6 = smov 64   ;;  %s242_s7 = smov 4  }
  0xf6   :  { %156 = dma.vmem_to_hbm [thread:$0]  %s151_s27, 256, %s299_s3, [#allocation3], %s241_s6, %s241_s6, %s242_s7  }
  0xf7   :  { %238 = dma.done.wait [#allocation3], 256  }
  0xf8   :  { %239 = vsyncadd [#allocation3], 4294967040 }
  0xf9   :  { %160 = vsyncpa [#allocation3], 1 }

</bundles_post_ra>
